<compile_context>
chip_gen: v7x
topology: tpu7x:2x2x1
jax: 0.10.0
libtpu: 0.0.40
codegen_flags: <defaults>
</compile_context>

<pallas_src>
import numpy as np
import jax
import jax.numpy as jnp
from jax.experimental import pallas as pl
from jax.experimental.pallas import tpu as pltpu


# ----------------------------------------------------------------------------
# Kernel
# ----------------------------------------------------------------------------
def _make_sepconv_kernel(cin, cout, hw, offsets):
    """Fused depthwise-3x3 + pointwise-1x1; one batch element per grid step.

    Refs seen by the kernel:
      x_ref : (Cin, EXT)      VMEM  flat image with a (W+1)-element zero halo
                                    on both ends (EXT = H*W + 2*(W+1))
      mw_ref: (9, Cin, HW)    VMEM  per-tap masked depthwise weights
      wp_ref: (Cin, Cout, 1)  VMEM  pointwise weights (lane-broadcastable)
      b_ref : (Cout, 1)       VMEM  fused bias (= b_pw + b_dw @ W_pw)
      o_ref : (Cout, HW)      VMEM  lane-dense output slab (HW % 128 == 0 here)
    """

    def kernel(x_ref, mw_ref, wp_ref, b_ref, o_ref):
        x = x_ref[...]      # (Cin, EXT)
        mw = mw_ref[...]    # (9, Cin, HW)

        # Depthwise 3x3: 9 static lane-offset slices of the flat halo'd image,
        # each MAC'd against its precomputed (border_mask * weight) slab.
        # Border zeroing lives in mw, so no per-tap conditionals.
        acc = None
        for t, off in enumerate(offsets):
            term = x[:, off:off + hw] * mw[t]          # (Cin, HW)
            acc = term if acc is None else acc + term

        # Pointwise 1x1: tiny channel counts -> unrolled VPU MAC.
        wp = wp_ref[...]    # (Cin, Cout, 1)
        out = None
        for c in range(cin):
            contrib = wp[c] * acc[c:c + 1, :]          # (Cout,1)*(1,HW)->(Cout,HW)
            out = contrib if out is None else out + contrib

        o_ref[...] = out + b_ref[...]                  # single dense store

    return kernel


# ----------------------------------------------------------------------------
# Wrapper
# ----------------------------------------------------------------------------
def separable_conv2d(x_nchw, dw_weight, dw_bias, pw_weight, pw_bias, *, stride=1):
    """SeparableConv2d.forward (kernel_size=3, padding=1, dilation=1).

    x_nchw   : (N, Cin, H, W)     float32
    dw_weight: (Cin, 1, 3, 3)     torch depthwise layout (groups=Cin)
    dw_bias  : (Cin,)
    pw_weight: (Cout, Cin, 1, 1)  torch pointwise layout
    pw_bias  : (Cout,)
    returns  : (N, Cout, Ho, Wo)  NCHW, same as PyTorch
    """
    x = x_nchw.astype(jnp.float32)
    n, cin, h, w = x.shape
    cout = pw_weight.shape[0]
    s = int(stride)
    ho = (h + 2 - 3) // s + 1
    wo = (w + 2 - 3) // s + 1

    hw = h * w
    halo = w + 1
    ext = hw + 2 * halo
    # Flat offset of tap (kh, kw) into the halo'd flat image.
    offsets = tuple(kh * w + kw for kh in range(3) for kw in range(3))

    # ---- parameter prep (host/XLA side, tiny) -------------------------------
    # Border masks: tap (kh, kw) contributes 0 wherever the original padded
    # conv would have read the zero padding.
    m = np.ones((3, 3, h, w), np.float32)
    m[0, :, 0, :] = 0.0
    m[2, :, h - 1, :] = 0.0
    m[:, 0, :, 0] = 0.0
    m[:, 2, :, w - 1] = 0.0
    masks = jnp.asarray(m.reshape(9, hw))                                    # (9, HW)

    wdw = jnp.transpose(dw_weight.reshape(cin, 9)).astype(jnp.float32)       # (9, Cin)
    mw = wdw[:, :, None] * masks[:, None, :]                                 # (9, Cin, HW)
    wpw = jnp.transpose(pw_weight[:, :, 0, 0]).astype(jnp.float32)           # (Cin, Cout)
    b_fused = (pw_bias.astype(jnp.float32)
               + dw_bias.astype(jnp.float32) @ wpw).reshape(cout, 1)         # (Cout, 1)
    wp3 = wpw.reshape(cin, cout, 1)                                          # (Cin, Cout, 1)

    # Flat halo'd input: x_ext[n, c, halo + f] == x[n, c, f // W, f % W].
    x_ext = jnp.pad(x.reshape(n, cin, hw), ((0, 0), (0, 0), (halo, halo)))   # (N, Cin, EXT)

    kernel = _make_sepconv_kernel(cin, cout, hw, offsets)

    out_flat = pl.pallas_call(
        kernel,
        out_shape=jax.ShapeDtypeStruct((n, cout, hw), jnp.float32),
        grid=(n,),
        in_specs=[
            # One flat halo'd image per step (a few KiB; whole problem in VMEM).
            pl.BlockSpec((None, cin, ext), lambda b: (b, 0, 0)),
            # Weight/bias tables: constant block index -> effectively resident.
            pl.BlockSpec((9, cin, hw), lambda b: (0, 0, 0)),
            pl.BlockSpec((cin, cout, 1), lambda b: (0, 0, 0)),
            pl.BlockSpec((cout, 1), lambda b: (0, 0)),
        ],
        # Lane-dense output: last block dim = H*W (256 here, a 128 multiple).
        out_specs=pl.BlockSpec((None, cout, hw), lambda b: (b, 0, 0)),
        compiler_params=pltpu.CompilerParams(
            # Batch elements are independent -> megacore-shard on v7x.
            dimension_semantics=("parallel",),
            # vmem_limit_bytes intentionally omitted: footprint is ~150 KiB.
        ),
    )(x_ext, mw, wp3, b_fused)

    out = out_flat.reshape(n, cout, h, w)
    if s > 1:
        # Exact: stride-s depthwise conv (pad=1) == subsampled stride-1 output,
        # and the 1x1 pointwise commutes with subsampling.
        # TODO(synk): dedicated strided kernel to skip unused positions when
        # stride>1 is used on large feature maps.
        out = out[:, :, ::s, ::s]
    assert out.shape == (n, cout, ho, wo)
    return out


# ----------------------------------------------------------------------------
# Pure-numpy reference (host-side)
# ----------------------------------------------------------------------------
def _sepconv_ref(x, dw_weight, dw_bias, pw_weight, pw_bias, stride):
    x = np.asarray(x, np.float32)
    n, cin, h, w = x.shape
    cout = pw_weight.shape[0]
    s = stride
    ho = (h + 2 - 3) // s + 1
    wo = (w + 2 - 3) // s + 1
    xp = np.pad(x, ((0, 0), (0, 0), (1, 1), (1, 1)))
    dw = np.zeros((n, cin, ho, wo), np.float32)
    for kh in range(3):
        for kw in range(3):
            tap = xp[:, :, kh:kh + (ho - 1) * s + 1:s, kw:kw + (wo - 1) * s + 1:s]
            dw += tap * np.asarray(dw_weight)[:, 0, kh, kw][None, :, None, None]
    dw += np.asarray(dw_bias)[None, :, None, None]
    out = np.einsum('nchw,oc->nohw', dw, np.asarray(pw_weight)[:, :, 0, 0])
    out += np.asarray(pw_bias)[None, :, None, None]
    return out


# ----------------------------------------------------------------------------
if __name__ == "__main__":
    N, Cin, H, W, Cout = 2, 4, 16, 16, 8

    key = jax.random.PRNGKey(0)
    k1, k2, k3, k4, k5 = jax.random.split(key, 5)
    x = jax.random.normal(k1, (N, Cin, H, W), jnp.float32)
    dw_weight = jax.random.normal(k2, (Cin, 1, 3, 3), jnp.float32) * 0.2
    dw_bias = jax.random.normal(k3, (Cin,), jnp.float32) * 0.1
    pw_weight = jax.random.normal(k4, (Cout, Cin, 1, 1), jnp.float32) * 0.2
    pw_bias = jax.random.normal(k5, (Cout,), jnp.float32) * 0.1

    out = separable_conv2d(x, dw_weight, dw_bias, pw_weight, pw_bias, stride=1)
    out = jax.block_until_ready(out)

    assert out.shape == (N, Cout, H, W)
    ref = _sepconv_ref(x, dw_weight, dw_bias, pw_weight, pw_bias, stride=1)
    assert np.all(np.isfinite(np.asarray(out)))
    assert np.allclose(np.asarray(out), ref, atol=2e-4, rtol=2e-4)
    print("KERNEL_OK")
</pallas_src>

<mosaic_0001>
module attributes {stable_mosaic.version = 11 : i64} {
  func.func @kernel(%arg0: i32, %arg1: memref<1x4x290xf32, #tpu.memory_space<vmem>>, %arg2: memref<9x4x256xf32, #tpu.memory_space<vmem>>, %arg3: memref<4x8x1xf32, #tpu.memory_space<vmem>>, %arg4: memref<8x1xf32, #tpu.memory_space<vmem>>, %arg5: memref<1x8x256xf32, #tpu.memory_space<vmem>>) attributes {dimension_semantics = [#tpu.dimension_semantics<parallel>], iteration_bounds = array<i64: 2>, scalar_prefetch = 0 : i64, scratch_operands = 0 : i64, tpu.core_type = #tpu.core_type<tc>, window_params = [{transform_indices = @transform_0, window_bounds = array<i64: 1, 4, 290>}, {pipeline_mode = #tpu.pipeline_mode<synchronous>, transform_indices = @transform_1, window_bounds = array<i64: 9, 4, 256>}, {pipeline_mode = #tpu.pipeline_mode<synchronous>, transform_indices = @transform_2, window_bounds = array<i64: 4, 8, 1>}, {pipeline_mode = #tpu.pipeline_mode<synchronous>, transform_indices = @transform_3, window_bounds = array<i64: 8, 1>}, {transform_indices = @transform_4, window_bounds = array<i64: 1, 8, 256>}]} {
    %c0 = arith.constant 0 : index
    %c0_0 = arith.constant 0 : index
    %c0_1 = arith.constant 0 : index
    %0 = vector.load %arg1[%c0, %c0_0, %c0_1] : memref<1x4x290xf32, #tpu.memory_space<vmem>>, vector<1x4x290xf32>
    %1 = vector.shape_cast %0 : vector<1x4x290xf32> to vector<4x290xf32>
    %c0_2 = arith.constant 0 : index
    %c0_3 = arith.constant 0 : index
    %c0_4 = arith.constant 0 : index
    %2 = vector.load %arg2[%c0_2, %c0_3, %c0_4] : memref<9x4x256xf32, #tpu.memory_space<vmem>>, vector<9x4x256xf32>
    %3 = vector.extract_strided_slice %1 {offsets = [0, 0], sizes = [4, 256], strides = [1, 1]} : vector<4x290xf32> to vector<4x256xf32>
    %4 = vector.extract_strided_slice %2 {offsets = [0, 0, 0], sizes = [1, 4, 256], strides = [1, 1, 1]} : vector<9x4x256xf32> to vector<1x4x256xf32>
    %5 = vector.shape_cast %4 : vector<1x4x256xf32> to vector<4x256xf32>
    %6 = arith.mulf %3, %5 : vector<4x256xf32>
    %7 = vector.extract_strided_slice %1 {offsets = [0, 1], sizes = [4, 256], strides = [1, 1]} : vector<4x290xf32> to vector<4x256xf32>
    %8 = vector.extract_strided_slice %2 {offsets = [1, 0, 0], sizes = [1, 4, 256], strides = [1, 1, 1]} : vector<9x4x256xf32> to vector<1x4x256xf32>
    %9 = vector.shape_cast %8 : vector<1x4x256xf32> to vector<4x256xf32>
    %10 = arith.mulf %7, %9 : vector<4x256xf32>
    %11 = arith.addf %6, %10 : vector<4x256xf32>
    %12 = vector.extract_strided_slice %1 {offsets = [0, 2], sizes = [4, 256], strides = [1, 1]} : vector<4x290xf32> to vector<4x256xf32>
    %13 = vector.extract_strided_slice %2 {offsets = [2, 0, 0], sizes = [1, 4, 256], strides = [1, 1, 1]} : vector<9x4x256xf32> to vector<1x4x256xf32>
    %14 = vector.shape_cast %13 : vector<1x4x256xf32> to vector<4x256xf32>
    %15 = arith.mulf %12, %14 : vector<4x256xf32>
    %16 = arith.addf %11, %15 : vector<4x256xf32>
    %17 = vector.extract_strided_slice %1 {offsets = [0, 16], sizes = [4, 256], strides = [1, 1]} : vector<4x290xf32> to vector<4x256xf32>
    %18 = vector.extract_strided_slice %2 {offsets = [3, 0, 0], sizes = [1, 4, 256], strides = [1, 1, 1]} : vector<9x4x256xf32> to vector<1x4x256xf32>
    %19 = vector.shape_cast %18 : vector<1x4x256xf32> to vector<4x256xf32>
    %20 = arith.mulf %17, %19 : vector<4x256xf32>
    %21 = arith.addf %16, %20 : vector<4x256xf32>
    %22 = vector.extract_strided_slice %1 {offsets = [0, 17], sizes = [4, 256], strides = [1, 1]} : vector<4x290xf32> to vector<4x256xf32>
    %23 = vector.extract_strided_slice %2 {offsets = [4, 0, 0], sizes = [1, 4, 256], strides = [1, 1, 1]} : vector<9x4x256xf32> to vector<1x4x256xf32>
    %24 = vector.shape_cast %23 : vector<1x4x256xf32> to vector<4x256xf32>
    %25 = arith.mulf %22, %24 : vector<4x256xf32>
    %26 = arith.addf %21, %25 : vector<4x256xf32>
    %27 = vector.extract_strided_slice %1 {offsets = [0, 18], sizes = [4, 256], strides = [1, 1]} : vector<4x290xf32> to vector<4x256xf32>
    %28 = vector.extract_strided_slice %2 {offsets = [5, 0, 0], sizes = [1, 4, 256], strides = [1, 1, 1]} : vector<9x4x256xf32> to vector<1x4x256xf32>
    %29 = vector.shape_cast %28 : vector<1x4x256xf32> to vector<4x256xf32>
    %30 = arith.mulf %27, %29 : vector<4x256xf32>
    %31 = arith.addf %26, %30 : vector<4x256xf32>
    %32 = vector.extract_strided_slice %1 {offsets = [0, 32], sizes = [4, 256], strides = [1, 1]} : vector<4x290xf32> to vector<4x256xf32>
    %33 = vector.extract_strided_slice %2 {offsets = [6, 0, 0], sizes = [1, 4, 256], strides = [1, 1, 1]} : vector<9x4x256xf32> to vector<1x4x256xf32>
    %34 = vector.shape_cast %33 : vector<1x4x256xf32> to vector<4x256xf32>
    %35 = arith.mulf %32, %34 : vector<4x256xf32>
    %36 = arith.addf %31, %35 : vector<4x256xf32>
    %37 = vector.extract_strided_slice %1 {offsets = [0, 33], sizes = [4, 256], strides = [1, 1]} : vector<4x290xf32> to vector<4x256xf32>
    %38 = vector.extract_strided_slice %2 {offsets = [7, 0, 0], sizes = [1, 4, 256], strides = [1, 1, 1]} : vector<9x4x256xf32> to vector<1x4x256xf32>
    %39 = vector.shape_cast %38 : vector<1x4x256xf32> to vector<4x256xf32>
    %40 = arith.mulf %37, %39 : vector<4x256xf32>
    %41 = arith.addf %36, %40 : vector<4x256xf32>
    %42 = vector.extract_strided_slice %1 {offsets = [0, 34], sizes = [4, 256], strides = [1, 1]} : vector<4x290xf32> to vector<4x256xf32>
    %43 = vector.extract_strided_slice %2 {offsets = [8, 0, 0], sizes = [1, 4, 256], strides = [1, 1, 1]} : vector<9x4x256xf32> to vector<1x4x256xf32>
    %44 = vector.shape_cast %43 : vector<1x4x256xf32> to vector<4x256xf32>
    %45 = arith.mulf %42, %44 : vector<4x256xf32>
    %46 = arith.addf %41, %45 : vector<4x256xf32>
    %c0_5 = arith.constant 0 : index
    %c0_6 = arith.constant 0 : index
    %c0_7 = arith.constant 0 : index
    %47 = vector.load %arg3[%c0_5, %c0_6, %c0_7] : memref<4x8x1xf32, #tpu.memory_space<vmem>>, vector<4x8x1xf32>
    %48 = vector.extract_strided_slice %47 {offsets = [0, 0, 0], sizes = [1, 8, 1], strides = [1, 1, 1]} : vector<4x8x1xf32> to vector<1x8x1xf32>
    %49 = vector.shape_cast %48 : vector<1x8x1xf32> to vector<8x1xf32>
    %50 = vector.extract_strided_slice %46 {offsets = [0, 0], sizes = [1, 256], strides = [1, 1]} : vector<4x256xf32> to vector<1x256xf32>
    %51 = vector.broadcast %49 : vector<8x1xf32> to vector<8x256xf32>
    %52 = vector.broadcast %50 : vector<1x256xf32> to vector<8x256xf32>
    %53 = arith.mulf %51, %52 : vector<8x256xf32>
    %54 = vector.extract_strided_slice %47 {offsets = [1, 0, 0], sizes = [1, 8, 1], strides = [1, 1, 1]} : vector<4x8x1xf32> to vector<1x8x1xf32>
    %55 = vector.shape_cast %54 : vector<1x8x1xf32> to vector<8x1xf32>
    %56 = vector.extract_strided_slice %46 {offsets = [1, 0], sizes = [1, 256], strides = [1, 1]} : vector<4x256xf32> to vector<1x256xf32>
    %57 = vector.broadcast %55 : vector<8x1xf32> to vector<8x256xf32>
    %58 = vector.broadcast %56 : vector<1x256xf32> to vector<8x256xf32>
    %59 = arith.mulf %57, %58 : vector<8x256xf32>
    %60 = arith.addf %53, %59 : vector<8x256xf32>
    %61 = vector.extract_strided_slice %47 {offsets = [2, 0, 0], sizes = [1, 8, 1], strides = [1, 1, 1]} : vector<4x8x1xf32> to vector<1x8x1xf32>
    %62 = vector.shape_cast %61 : vector<1x8x1xf32> to vector<8x1xf32>
    %63 = vector.extract_strided_slice %46 {offsets = [2, 0], sizes = [1, 256], strides = [1, 1]} : vector<4x256xf32> to vector<1x256xf32>
    %64 = vector.broadcast %62 : vector<8x1xf32> to vector<8x256xf32>
    %65 = vector.broadcast %63 : vector<1x256xf32> to vector<8x256xf32>
    %66 = arith.mulf %64, %65 : vector<8x256xf32>
    %67 = arith.addf %60, %66 : vector<8x256xf32>
    %68 = vector.extract_strided_slice %47 {offsets = [3, 0, 0], sizes = [1, 8, 1], strides = [1, 1, 1]} : vector<4x8x1xf32> to vector<1x8x1xf32>
    %69 = vector.shape_cast %68 : vector<1x8x1xf32> to vector<8x1xf32>
    %70 = vector.extract_strided_slice %46 {offsets = [3, 0], sizes = [1, 256], strides = [1, 1]} : vector<4x256xf32> to vector<1x256xf32>
    %71 = vector.broadcast %69 : vector<8x1xf32> to vector<8x256xf32>
    %72 = vector.broadcast %70 : vector<1x256xf32> to vector<8x256xf32>
    %73 = arith.mulf %71, %72 : vector<8x256xf32>
    %74 = arith.addf %67, %73 : vector<8x256xf32>
    %c0_8 = arith.constant 0 : index
    %c0_9 = arith.constant 0 : index
    %75 = vector.load %arg4[%c0_8, %c0_9] : memref<8x1xf32, #tpu.memory_space<vmem>>, vector<8x1xf32>
    %76 = vector.broadcast %75 : vector<8x1xf32> to vector<8x256xf32>
    %77 = arith.addf %74, %76 : vector<8x256xf32>
    %c0_10 = arith.constant 0 : index
    %c0_11 = arith.constant 0 : index
    %c0_12 = arith.constant 0 : index
    %78 = vector.load %arg5[%c0_10, %c0_11, %c0_12] : memref<1x8x256xf32, #tpu.memory_space<vmem>>, vector<1x8x256xf32>
    %79 = vector.shape_cast %78 : vector<1x8x256xf32> to vector<8x256xf32>
    %80 = vector.shape_cast %77 : vector<8x256xf32> to vector<1x8x256xf32>
    tpu.vector_store %arg5[%c0_10, %c0_11, %c0_12], %80 {strides = array<i32>} : memref<1x8x256xf32, #tpu.memory_space<vmem>>, vector<1x8x256xf32>,
    return
  }
  func.func @transform_0(%arg0: i32) -> (i32, i32, i32) {
    %c0_i32 = arith.constant 0 : i32
    %c0_i32_0 = arith.constant 0 : i32
    %c0_i32_1 = arith.constant 0 : i32
    return %arg0, %c0_i32, %c0_i32_0 : i32, i32, i32
  }
  func.func @transform_1(%arg0: i32) -> (i32, i32, i32) {
    %c0_i32 = arith.constant 0 : i32
    %c0_i32_0 = arith.constant 0 : i32
    %c0_i32_1 = arith.constant 0 : i32
    %c0_i32_2 = arith.constant 0 : i32
    return %c0_i32, %c0_i32_0, %c0_i32_1 : i32, i32, i32
  }
  func.func @transform_2(%arg0: i32) -> (i32, i32, i32) {
    %c0_i32 = arith.constant 0 : i32
    %c0_i32_0 = arith.constant 0 : i32
    %c0_i32_1 = arith.constant 0 : i32
    %c0_i32_2 = arith.constant 0 : i32
    return %c0_i32, %c0_i32_0, %c0_i32_1 : i32, i32, i32
  }
  func.func @transform_3(%arg0: i32) -> (i32, i32) {
    %c0_i32 = arith.constant 0 : i32
    %c0_i32_0 = arith.constant 0 : i32
    %c0_i32_1 = arith.constant 0 : i32
    return %c0_i32, %c0_i32_0 : i32, i32
  }
  func.func @transform_4(%arg0: i32) -> (i32, i32, i32) {
    %c0_i32 = arith.constant 0 : i32
    %c0_i32_0 = arith.constant 0 : i32
    %c0_i32_1 = arith.constant 0 : i32
    return %arg0, %c0_i32, %c0_i32_0 : i32, i32, i32
  }
}

</mosaic_0001>

<bundles_post_ra>
// kernel: tpu_custom_call.1
= control target key start
LH: loop header
LB: loop body
LE: loop exit
PB: predicated region body
PF: predicated region fallthrough
CT: control target
= control target key end

     0   :  { %9 = vsyncpa [#allocation3], 0  ;;  %s1026_s0 = inlined_call_operand.vmem [shape: f32[2,4,290], index: 0, kind: input, shape index: {}]   ;;  %s1027_s1 = inlined_call_operand.hbm [shape: f32[9,4,256], index: 1, kind: input, shape index: {}]   ;;  %s1028_s2 = inlined_call_operand.vmem [shape: f32[4,8,1], index: 2, kind: input, shape index: {}]   ;;  %s1029_s3 = inlined_call_operand.vmem [shape: f32[8,1], index: 3, kind: input, shape index: {}]   ;;  %s1030_s4 = inlined_call_operand.hbm [shape: f32[2,8,256], index: 4, kind: output, shape index: {}]  }
   0x1   :  { %10 = vsyncpa [#allocation4], 0 }
   0x2   :  { %12 = vsyncpa [#allocation4 + $0x1], 0  ;;  %s843_s15 = smov 0   ;;  %s845_s16 = smov 0  }
   0x3   :  { %s847_s17 = smov 0   ;;  %s849_s18 = smov 0  }
   0x4 LB: > { %s864_s19 = sadd.s32 4294967295, %s795_s18   ;;  %s615_s20 = sadd.s32 4294967294, %s795_s18   ;;  %s795_s18 = sphi %s849_s18, %s1046_s18   ;;  %s791_s17 = sphi %s847_s17, %s1045_s17   ;;  %s787_s16 = sphi %s845_s16, %s1044_s16   ;;  %s783_s15 = sphi %s843_s15, %s1043_s15  }
   0x5   : > { %s868_s21 = sadd.s32 1, %s795_s18   ;;  %s114_s22 = sadd.s32 1, %s791_s17 }
   0x6   : > { %s111_s23 = ssub.s32 %s795_s18, %s868_s21  ;;  %p124_p0 = scmp.ne.s32.totalorder %s791_s17, %s787_s16 }
   0x7   : > { %p112_p1 = scmp.eq.s32.totalorder %s111_s23, 0  ;;  %p125_p2 = scmp.eq.s32.totalorder %s864_s19, 1 }
   0x8   : > { %p130_p3 = scmp.ne.s32.totalorder %s787_s16, %s783_s15  ;;  %p131_p4 = scmp.eq.s32.totalorder %s615_s20, 1 }
   0x9   : > { %s879_s24 = scalar_select %p112_p1, %s791_s17, %s114_s22  }
   0xa   : > { %p881_p5 = por %p125_p2, %p124_p0  ;;  %p885_p6 = por %p131_p4, %p130_p3 }
   0xb   : > { %p616_p7 = scmp.ge.s32.totalorder %s795_s18, 1  ;;  %p138_p8 = scmp.lt.s32.totalorder %s795_s18, 3 }
   0xc   : > { %s1034_s25 = scalar_select %p881_p5, 1, 0 }
   0xd   : > { %s1035_s26 = scalar_select %p885_p6, 1, 0 }
   0xe   : > { %p1031_p9 = scmp.eq.s32.totalorder %s864_s19, 0  ;;  %p892_p10 = pnand %p616_p7, %p138_p8 }
   0xf   : > { %s797_s28 = smov [#allocation2]   ;;  %s701_s7 = scalar_lea.hbm %s1027_s1, 1152 }
  0x10   : > { %s1036_s27 = scalar_select %p892_p10, 1, 0 }
  0x11   : > { %s150_s29 = sshll.u32 %s797_s28, 4  ;;  %p636_p11 = pneg %p892_p10  ;;  %s151_s29 = int_to_ptr.vmem [resolvable:$true] %s150_s29 }
  0x12   : > { %p702_p13 = scmp.ne.s32.totalorder %s1027_s1, %s701_s7  ;;  %p708_p3 = scmp.lt.u32.totalorder %s701_s7, %s1027_s1 }
  0x13   : > { %p900_p12 = pnand %p1031_p9, %p636_p11 }
  0x15   : > { %p703_p0 = pneg %p900_p12 }
  0x17   : > { %p704_p1 = pnand %p703_p0, %p702_p13 }
  0x19   : > { %p705_p2 = pneg %p704_p1 }
  0x1b   : > { %p710_p4 = pnand %p708_p3, %p705_p2 }
  0x1d   : > { %713 = shalt.err (!%p710_p4)
}
  0x1e   : > { %s714_s12 = scalar_lea.vmem %s151_s29, 1152  ;;  %p722_p9 = scmp.lt.s32.totalorder %s151_s29, %s151_s29 }
  0x1f   : > { %p715_p7 = scmp.ne.s32.totalorder %s151_s29, %s714_s12  ;;  %p723_p6 = scmp.lt.s32.totalorder %s714_s12, %s714_s12 }
  0x21   : > { %p717_p8 = pnand %p715_p7, %p703_p0  ;;  %p724_p5 = por %p723_p6, %p722_p9 }
  0x23   : > { %p718_p11 = pneg %p717_p8 }
  0x25   : > { %p725_p10 = pnand %p724_p5, %p718_p11 }
  0x27   : > { %728 = shalt.err (!%p725_p10)
}
  0x28   : > { %s798_s13 = smov 128   ;;  %s799_s14 = smov 8  }
  0x29   : > { %639 = dma.hbm_to_vmem [thread:$0]  (!%p900_p12), %s1027_s1, 1152, %s151_s29, [#allocation3], %s798_s13, %s798_s13, %s799_s14  }
  0x2a   : > { %p1038_p13 = scmp.ne.s32.totalorder %s1036_s27, 0 }
  0x2b   : > { %p1039_p1 = scmp.eq.s32.totalorder (!%p1038_p13), %s864_s19, 0 }
  0x2c   : > { %180 = sbr.rel (%p1038_p13) target bundleno = 358 (0x166), region = 36 }
  0x33   : > { %774 = dma.done.wait (%p1039_p1), [#allocation3], 1152   ;;  %p1040_p0 = pmov %p1039_p1 }
  0x34   : > { %v214_v0 = vld [vmem:[#allocation2 + $0x8] sm:$0xff]  ;;  %v216_v1 = vld [vmem:[#allocation2 + $0x18] sm:$0xff]  ;;  %s800_s23 = smov 1   ;;  %s801_s28 = smov 16   ;;  %v215_v2 = vld [vmem:[#allocation2 + $0x10] sm:$0xff]  ;;  %v808_v8 = vmov 0  }
  0x35   : > { %776 = vsyncadd (%p1040_p0), [#allocation3], 4294966144  ;;  %224 = vrot.lane.b32.xlu0 %v214_v0, %s800_s23  ;;  %271 = vrot.lane.b32.xlu1 %v216_v1, %s801_s28  ;;  %v217_v3 = vld [vmem:[#allocation2 + $0x20] sm:$0xff]  ;;  %s802_s30 = smov 2   ;;  %s803_s29 = smov 17   ;;  %v218_v4 = vld [vmem:[#allocation2 + $0x28] sm:$0xff] }
  0x36   : > { %v219_v5 = vld [vmem:[#allocation2 + $0x30] sm:$0xff]  ;;  %s804_s27 = smov 18   ;;  %s805_s5 = smov 32   ;;  %v220_v6 = vld [vmem:[#allocation2 + $0x38] sm:$0xff]  ;;  %v221_v7 = vld [vmem:[#allocation2 + $0x40] sm:$0xff]  ;;  %700 = vset.pattern.permute.xlu1 %v808_v8  ;;  %699 = vset.pattern.permute.xlu0 %v808_v8  ;;  %vm227_vm0 = vcmask 7168  }
  0x37   : > { %s806_s6 = smov 33   ;;  %s807_s7 = smov 34   ;;  %vm251_vm1 = vcmask 15360   ;;  %vm274_vm2 = vcmask 130048   ;;  %vm297_vm3 = vcmask 138240   ;;  %vm320_vm4 = vcmask 146432  }
  0x38   : > { %p206_p5 = scmp.lt.s32.totalorder %s864_s19, 1  ;;  %s809_s13 = smov 127   ;;  %vm343_vm5 = vcmask 261120   ;;  %vm366_vm6 = vcmask 269312   ;;  %vm389_vm7 = vcmask 277504   ;;  %v409_v51 = vld [vmem:[%s1028_s2 + $0x8] sm:$0xff] }
  0x39   : > { %248 = vrot.lane.b32.xlu0 %v215_v2, %s802_s30  ;;  %294 = vrot.lane.b32.xlu1 %v217_v3, %s803_s29  ;;  %s810_s14 = smov 126   ;;  %s811_s20 = smov 112   ;;  %v408_v52 = vld [vmem:[%s1028_s2] sm:$0xff]  ;;  %v410_v53 = vld [vmem:[%s1028_s2 + $0x10] sm:$0xff]  ;;  %vm241_vm8 = vcmask 1043456   ;;  %vm243_vm9 = vcmask 1039360  }
  0x3a   : > { %s207_s8 = scalar_select %p206_p5, %s864_s19, 1  ;;  %v411_v54 = vld [vmem:[%s1028_s2 + $0x18] sm:$0xff]  ;;  %v519_v55 = vld [vmem:[%s1029_s3] sm:$0xff]  ;;  %vm266_vm10 = vcmask 1031168   ;;  %vm289_vm11 = vcmask 916480   ;;  %vm312_vm12 = vcmask 908288  }
  0x3b   : > { %s812_s22 = smov 111   ;;  %s813_s23 = smov 110   ;;  %v213_v2 = vld [vmem:[#allocation2] sm:$0xff]  ;;  %vm335_vm13 = vcmask 900096   ;;  %vm358_vm14 = vcmask 785408   ;;  %vm381_vm15 = vcmask 777216  }
  0x3c   : > { %s629_s9 = smul.u32 12, %s207_s8  ;;  %s814_s28 = smov 96  }
  0x3d   : > { %317 = vrot.lane.b32.xlu0 %v218_v4, %s804_s27  ;;  %340 = vrot.lane.b32.xlu1 %v219_v5, %s805_s5  ;;  %s815_s30 = smov 95   ;;  %s816_s29 = smov 94  }
  0x3e   : > { %s210_s12 = scalar_lea.vmem %s1026_s0, %s629_s9  ;;  %p1041_p9 = scmp.ne.s32.totalorder %s1034_s25, 0 }
  0x3f   : > { %v931_v10 = vld [vmem:[%s210_s12 + $0x8] sm:$0xf]  ;;  %v933_v12 = vld [vmem:[%s210_s12] sm:$0xff] }
  0x41   : > { %363 = vrot.lane.b32.xlu0 %v220_v6, %s806_s6  ;;  %386 = vrot.lane.b32.xlu1 %v221_v7, %s807_s7  ;;  %s817_s6 = smov [#allocation5]  }
  0x42   : > { %s733_s7 = sshll.u32 %s817_s6, 4  ;;  %s734_s7 = int_to_ptr.vmem [resolvable:$false] %s733_s7 }
  0x43   : > { %s735_s8 = scalar_lea.vmem %s734_s7, 512 }
  0xa7   : > { %v225_v9 = vpop.permute.xlu0 %224  ;;  %v272_v11 = vpop.permute.xlu1 %271 }
  0xa8   : > { %v226_v13 = vrot.slane %v225_v9, 4  ;;  %v273_v19 = vrot.slane %v272_v11, 4 }
  0xaa   : > { %v228_v14 = vsel %vm227_vm0, %v226_v13, %v225_v9  ;;  %v232_v15 = vmul.f32 %v226_v13, %v931_v10  ;;  %v275_v24 = vsel %vm274_vm2, %v273_v19, %v272_v11  ;;  %v279_v25 = vmul.f32 %v273_v19, %v931_v10 }
  0xab   : > { %v231_v16 = vmul.f32 %v228_v14, %v933_v12  ;;  %v249_v17 = vpop.permute.xlu0 %248  ;;  %v295_v20 = vpop.permute.xlu1 %294  ;;  %v278_v28 = vmul.f32 %v275_v24, %v933_v12  ;;  %v222_v9 = vmul.f32 %v213_v2, %v933_v12  ;;  %vm404_vm0 = vcmask 769024  }
  0xac   : > { %v250_v18 = vrot.slane %v249_v17, 4  ;;  %237 = vrot.lane.b32.xlu1 %v232_v15, %s809_s13  ;;  %v296_v26 = vrot.slane %v295_v20, 4 }
  0xad   : > { %235 = vrot.lane.b32.xlu0 %v231_v16, %s809_s13 }
  0xae   : > { %v252_v21 = vsel %vm251_vm1, %v250_v18, %v249_v17  ;;  %v256_v22 = vmul.f32 %v250_v18, %v931_v10  ;;  %v298_v29 = vsel %vm297_vm3, %v296_v26, %v295_v20  ;;  %v302_v30 = vmul.f32 %v296_v26, %v931_v10 }
  0xaf   : > { %v255_v23 = vmul.f32 %v252_v21, %v933_v12  ;;  %v318_v27 = vpop.permute.xlu0 %317  ;;  %v341_v32 = vpop.permute.xlu1 %340  ;;  %v301_v33 = vmul.f32 %v298_v29, %v933_v12 }
  0xb0   : > { %261 = vrot.lane.b32.xlu1 %v256_v22, %s810_s14  ;;  %v319_v31 = vrot.slane %v318_v27, 4  ;;  %v342_v36 = vrot.slane %v341_v32, 4 }
  0xb1   : > { %259 = vrot.lane.b32.xlu0 %v255_v23, %s810_s14  ;;  %s203_s14 = sand.u32 1, %s787_s16  }
  0xb2   : > { %v321_v34 = vsel %vm320_vm4, %v319_v31, %v318_v27  ;;  %v325_v35 = vmul.f32 %v319_v31, %v931_v10  ;;  %v344_v39 = vsel %vm343_vm5, %v342_v36, %v341_v32  ;;  %v348_v40 = vmul.f32 %v342_v36, %v931_v10 }
  0xb3   : > { %v364_v37 = vpop.permute.xlu0 %363  ;;  %v324_v38 = vmul.f32 %v321_v34, %v933_v12  ;;  %v387_v42 = vpop.permute.xlu1 %386  ;;  %v347_v43 = vmul.f32 %v344_v39, %v933_v12  ;;  %v418_v39 = vlaneseq }
  0xb4   : > { %284 = vrot.lane.b32.xlu1 %v279_v25, %s811_s20  ;;  %v365_v41 = vrot.slane %v364_v37, 4  ;;  %v388_v46 = vrot.slane %v387_v42, 4 }
  0xb5   : > { %282 = vrot.lane.b32.xlu0 %v278_v28, %s811_s20  ;;  %s621_s20 = sshll.u32 %s203_s14, 4 }
  0xb6   : > { %v367_v44 = vsel %vm366_vm6, %v365_v41, %v364_v37  ;;  %v371_v45 = vmul.f32 %v365_v41, %v931_v10  ;;  %v390_v48 = vsel %vm389_vm7, %v388_v46, %v387_v42  ;;  %v394_v49 = vmul.f32 %v388_v46, %v931_v10 }
  0xb7   : > { %v370_v47 = vmul.f32 %v367_v44, %v933_v12  ;;  %v393_v50 = vmul.f32 %v390_v48, %v933_v12  ;;  %v419_v48 = vshrl.u32 %v418_v39, 7 }
  0xb8   : > { %307 = vrot.lane.b32.xlu1 %v302_v30, %s812_s22 }
  0xb9   : > { %305 = vrot.lane.b32.xlu0 %v301_v33, %s812_s22  ;;  %s628_s22 = sshll.u32 %s864_s19, 8  ;;  %s530_s19 = scalar_lea.sflag [#allocation4], %s203_s14 }
  0xba   : > { %s982_s27 = scalar_lea.hbm %s1030_s4, %s628_s22 }
  0xbc   : > { %330 = vrot.lane.b32.xlu1 %v325_v35, %s813_s23 }
  0xbd   : > { %328 = vrot.lane.b32.xlu0 %v324_v38, %s813_s23  ;;  %s205_s23 = scalar_lea.vmem [#allocation5], %s621_s20 }
  0xc0   : > { %353 = vrot.lane.b32.xlu1 %v348_v40, %s814_s28 }
  0xc1   : > { %351 = vrot.lane.b32.xlu0 %v347_v43, %s814_s28  ;;  %s544_s28 = sshll.u32 %s205_s23, 4  ;;  %s984_s28 = int_to_ptr.vmem [resolvable:$true] %s544_s28 }
  0xc2   : > { %s729_s5 = scalar_lea.vmem %s984_s28, 256  ;;  %p736_p2 = scmp.lt.s32.totalorder %s984_s28, %s734_s7 }
  0xc3   : > { %p730_p6 = scmp.ne.s32.totalorder %s984_s28, %s729_s5  ;;  %p737_p3 = scmp.lt.s32.totalorder %s735_s8, %s729_s5 }
  0xc4   : > { %376 = vrot.lane.b32.xlu1 %v371_v45, %s815_s30 }
  0xc5   : > { %374 = vrot.lane.b32.xlu0 %v370_v47, %s815_s30  ;;  %p731_p10 = pnand %p730_p6, %p1041_p9  ;;  %p738_p4 = por %p737_p3, %p736_p2 }
  0xc7   : > { %p732_p12 = pneg %p731_p10 }
  0xc8   : > { %399 = vrot.lane.b32.xlu1 %v394_v49, %s816_s29 }
  0xc9   : > { %397 = vrot.lane.b32.xlu0 %v393_v50, %s816_s29  ;;  %p739_p7 = pnand %p738_p4, %p732_p12 }
  0xcc   : > { %440 = vperm.xlu1 %700, %v409_v51  }
  0xcd   : > { %414 = vperm.xlu0 %699, %v408_v52   ;;  %v445_v52 = vsub.s32 1, %v419_v48 }
  0xd0   : > { %467 = vperm.xlu1 %700, %v410_v53   ;;  %v449_v53 = vsub.s32 5, %v419_v48 }
  0xd1   : > { %494 = vperm.xlu0 %699, %v411_v54   ;;  %v420_v54 = vsub.s32 0, %v419_v48 }
  0xd4   : > { %522 = vperm.xlu1 %700, %v519_v55   ;;  %v424_v55 = vsub.s32 4, %v419_v48 }
 0x11e   : > { %v238_v56 = vpop.permute.xlu1 %237 }
 0x11f   : > { %v236_v57 = vpop.permute.xlu0 %235  ;;  %v240_v62 = vrot.slane %v238_v56, 4 }
 0x120   : > { %v239_v63 = vrot.slane %v236_v57, 4 }
 0x122   : > { %v262_v58 = vpop.permute.xlu1 %261  ;;  %v242_v5 = vsel %vm241_vm8, %v239_v63, %v240_v62  ;;  %v499_v62 = vsub.s32 3, %v419_v48  ;;  %v503_v63 = vsub.s32 7, %v419_v48 }
 0x123   : > { %v260_v59 = vpop.permute.xlu0 %259  ;;  %v264_v3 = vrot.slane %v262_v58, 4  ;;  %v244_v15 = vsel %vm243_vm9, %v236_v57, %v242_v5  ;;  %v472_v58 = vsub.s32 2, %v419_v48 }
 0x124   : > { %v263_v4 = vrot.slane %v260_v59, 4  ;;  %v246_v22 = vadd.f32 %v244_v15, %v222_v9 }
 0x126   : > { %v285_v60 = vpop.permute.xlu1 %284  ;;  %v265_v11 = vsel %vm241_vm8, %v263_v4, %v264_v3 }
 0x127   : > { %v283_v61 = vpop.permute.xlu0 %282  ;;  %v287_v6 = vrot.slane %v285_v60, 4  ;;  %v267_v20 = vsel %vm266_vm10, %v260_v59, %v265_v11  ;;  %v476_v59 = vsub.s32 6, %v419_v48 }
 0x128   : > { %v286_v7 = vrot.slane %v283_v61, 4  ;;  %v269_v26 = vadd.f32 %v267_v20, %v246_v22 }
 0x12a   : > { %v308_v0 = vpop.permute.xlu1 %307  ;;  %v288_v16 = vsel %vm241_vm8, %v286_v7, %v287_v6 }
 0x12b   : > { %v306_v1 = vpop.permute.xlu0 %305  ;;  %v310_v13 = vrot.slane %v308_v0, 4  ;;  %v290_v25 = vsel %vm289_vm11, %v283_v61, %v288_v16 }
 0x12c   : > { %v309_v14 = vrot.slane %v306_v1, 4  ;;  %v292_v32 = vadd.f32 %v290_v25, %v269_v26 }
 0x12e   : > { %v331_v8 = vpop.permute.xlu1 %330  ;;  %v311_v23 = vsel %vm241_vm8, %v309_v14, %v310_v13 }
 0x12f   : > { %v329_v10 = vpop.permute.xlu0 %328  ;;  %v333_v17 = vrot.slane %v331_v8, 4  ;;  %v313_v29 = vsel %vm312_vm12, %v306_v1, %v311_v23 }
 0x130   : > { %v332_v18 = vrot.slane %v329_v10, 4  ;;  %v315_v36 = vadd.f32 %v313_v29, %v292_v32 }
 0x132   : > { %v354_v19 = vpop.permute.xlu1 %353  ;;  %v334_v27 = vsel %vm241_vm8, %v332_v18, %v333_v17 }
 0x133   : > { %v352_v21 = vpop.permute.xlu0 %351  ;;  %v356_v12 = vrot.slane %v354_v19, 4  ;;  %v336_v35 = vsel %vm335_vm13, %v329_v10, %v334_v27 }
 0x134   : > { %v355_v24 = vrot.slane %v352_v21, 4  ;;  %v338_v43 = vadd.f32 %v336_v35, %v315_v36 }
 0x136   : > { %v377_v28 = vpop.permute.xlu1 %376  ;;  %v357_v33 = vsel %vm241_vm8, %v355_v24, %v356_v12 }
 0x137   : > { %v379_v30 = vrot.slane %v377_v28, 4  ;;  %v375_v31 = vpop.permute.xlu0 %374  ;;  %v359_v40 = vsel %vm358_vm14, %v352_v21, %v357_v33 }
 0x138   : > { %v378_v34 = vrot.slane %v375_v31, 4  ;;  %v361_v46 = vadd.f32 %v359_v40, %v338_v43 }
 0x13a   : > { %v380_v37 = vsel %vm241_vm8, %v378_v34, %v379_v30  ;;  %v400_v38 = vpop.permute.xlu1 %399 }
 0x13b   : > { %v402_v41 = vrot.slane %v400_v38, 4  ;;  %v398_v42 = vpop.permute.xlu0 %397  ;;  %v382_v45 = vsel %vm381_vm15, %v375_v31, %v380_v37 }
 0x13c   : > { %v401_v44 = vrot.slane %v398_v42, 4  ;;  %v384_v50 = vadd.f32 %v382_v45, %v361_v46 }
 0x13e   : > { %v403_v47 = vsel %vm241_vm8, %v401_v44, %v402_v41 }
 0x13f   : > { %v405_v49 = vsel %vm404_vm0, %v398_v42, %v403_v47 }
 0x140   : > { %v407_v51 = vadd.f32 %v405_v49, %v384_v50 }
 0x142   : > { %v446_v56 = vrot.slane %v407_v51, %v445_v52  ;;  %v450_v57 = vrot.slane %v407_v51, %v449_v53  ;;  %v421_v60 = vrot.slane %v407_v51, %v420_v54  ;;  %v425_v61 = vrot.slane %v407_v51, %v424_v55 }
 0x143   : > { %v473_v2 = vrot.slane %v407_v51, %v472_v58  ;;  %v477_v3 = vrot.slane %v407_v51, %v476_v59  ;;  %v500_v7 = vrot.slane %v407_v51, %v499_v62  ;;  %v504_v8 = vrot.slane %v407_v51, %v503_v63 }
 0x144   : > { %v456_v0 = vrot.slane %v446_v56, %v445_v52  ;;  %v460_v1 = vrot.slane %v450_v57, %v445_v52  ;;  %v431_v5 = vrot.slane %v421_v60, %v420_v54  ;;  %v435_v6 = vrot.slane %v425_v61, %v420_v54 }
 0x145   : > { %v483_v15 = vrot.slane %v473_v2, %v472_v58  ;;  %v487_v16 = vrot.slane %v477_v3, %v472_v58  ;;  %v510_v20 = vrot.slane %v500_v7, %v499_v62  ;;  %v514_v21 = vrot.slane %v504_v8, %v499_v62 }
 0x14b   : > { %v441_v4 = vpop.permute.xlu1 %440 }
 0x14c   : > { %v461_v9 = vmul.f32 %v456_v0, %v441_v4  ;;  %v462_v10 = vmul.f32 %v460_v1, %v441_v4  ;;  %v415_v11 = vpop.permute.xlu0 %414 }
 0x14d   : > { %v436_v13 = vmul.f32 %v431_v5, %v415_v11  ;;  %v437_v14 = vmul.f32 %v435_v6, %v415_v11 }
 0x14f   : > { %v463_v17 = vadd.f32 %v461_v9, %v436_v13  ;;  %v464_v18 = vadd.f32 %v462_v10, %v437_v14  ;;  %v468_v19 = vpop.permute.xlu1 %467 }
 0x150   : > { %v488_v22 = vmul.f32 %v483_v15, %v468_v19  ;;  %v489_v23 = vmul.f32 %v487_v16, %v468_v19  ;;  %v495_v12 = vpop.permute.xlu0 %494 }
 0x151   : > { %v515_v24 = vmul.f32 %v510_v20, %v495_v12  ;;  %v516_v25 = vmul.f32 %v514_v21, %v495_v12 }
 0x152   : > { %v490_v26 = vadd.f32 %v488_v22, %v463_v17  ;;  %v491_v27 = vadd.f32 %v489_v23, %v464_v18 }
 0x153   : > { %v523_v30 = vpop.permute.xlu1 %522 }
 0x154   : > { %v517_v28 = vadd.f32 %v515_v24, %v490_v26  ;;  %v518_v29 = vadd.f32 %v516_v25, %v491_v27 }
 0x156   : > { %v525_v31 = vadd.f32 %v523_v30, %v517_v28  ;;  %v526_v32 = vadd.f32 %v523_v30, %v518_v29 }
 0x158   : > { %527 = vst [vmem:[%s205_s23] sm:$0xff] %v525_v31  ;;  %528 = vst [vmem:[%s205_s23 + $0x8] sm:$0xff] %v526_v32 }
 0x159   : > { %742 = shalt.err (!%p739_p7)
}
 0x15a   : > { %s743_s9 = scalar_lea.hbm %s982_s27, 256  ;;  %s747_s12 = scalar_lea.hbm %s1030_s4, 512 }
 0x15b   : > { %p744_p8 = scmp.ne.s32.totalorder %s982_s27, %s743_s9  ;;  %p748_p1 = scmp.lt.u32.totalorder %s982_s27, %s1030_s4 }
 0x15c   : > { %p749_p0 = scmp.lt.u32.totalorder %s747_s12, %s743_s9  ;;  %p751_p6 = scmp.lt.u32.totalorder %s743_s9, %s982_s27 }
 0x15d   : > { %p745_p11 = pnand %p744_p8, %p1041_p9 }
 0x15e   : > { %p750_p5 = por %p749_p0, %p748_p1 }
 0x15f   : > { %p746_p13 = pneg %p745_p11 }
 0x160   : > { %p752_p10 = por %p751_p6, %p750_p5 }
 0x162   : > { %p753_p12 = pnand %p752_p10, %p746_p13 }
 0x164   : > { %756 = shalt.err (!%p753_p12)
}
 0x165   : > { %634 = dma.vmem_to_hbm [thread:$0]  (%p1041_p9), %s984_s28, 256, %s982_s27, %s530_s19  }
 0x166 PF: > { %p646_p2 = scmp.ge.s32.totalorder %s795_s18, 2  ;;  %s556_s20 = sand.u32 1, %s783_s15  }
 0x167   : > { %p1042_p3 = scmp.ne.s32.totalorder %s1035_s26, 0  ;;  %s557_s22 = scalar_lea.sflag [#allocation4], %s556_s20 }
 0x169   : > { %p641_p4 = pnand %p646_p2, %p1042_p3 }
 0x16b   : > { %778 = dma.done.wait (!%p641_p4), %s557_s22, 256  }
 0x16c   : > { %780 = vsyncadd (!%p641_p4), %s557_s22, 4294967040  ;;  %p15_p7 = scmp.ge.s32.totalorder %s868_s21, 4   ;;  %s1043_s15 = smov %s787_s16 }
 0x16d   : > { %s1044_s16 = smov %s791_s17  ;;  %s1045_s17 = smov %s879_s24 }
 0x16e   : > { %s1046_s18 = smov %s868_s21  ;;  %17 = sbr.rel (!%p15_p7) target bundleno = 4 (0x4), region = 76 }
 0x175   :  { %562 = vsyncpa [#allocation3], 1 }
 0x176   :  { %564 = vsyncpa [#allocation3 + $0x1], 1 }
 0x177   :  { %565 = vsyncpa [#allocation4], 1 }
 0x178   :  { %567 = vsyncpa [#allocation4 + $0x1], 1 }

</bundles_post_ra>
